<compile_context>
chip_gen: v7x
topology: tpu7x:2x2x1
jax: 0.10.0
libtpu: 0.0.40
codegen_flags: <defaults>
</compile_context>

<pallas_src>
import jax
import jax.numpy as jnp
from jax.experimental import pallas as pl
from jax.experimental.pallas import tpu as pltpu


# -----------------------------------------------------------------------------
# Kernels
# -----------------------------------------------------------------------------
def _qnet_fwd_kernel(xt_ref, w1_ref, b1_ref, w2_ref, b2_ref, qt_ref):
    """One batch tile, transposed (lane-dense) layout.

    xt_ref : [n_in, TB]   activations, batch on lanes
    w1_ref : [H, n_in]    PyTorch layout == already-transposed weight
    b1_ref : [H, 1]       column bias, broadcasts over lanes
    w2_ref : [n_out, H]
    b2_ref : [n_out, 1]
    qt_ref : [n_out, TB]
    """
    h = jnp.dot(w1_ref[...], xt_ref[...], preferred_element_type=jnp.float32)
    h = jnp.maximum(h + b1_ref[...], 0.0)
    q = jnp.dot(w2_ref[...], h, preferred_element_type=jnp.float32)
    qt_ref[...] = q + b2_ref[...]


def _qnet_act_kernel(xt_ref, w1_ref, b1_ref, w2_ref, b2_ref, qt_ref, act_ref):
    """Tiny-batch act() path: forward pass + fused argmax in one launch."""
    h = jnp.dot(w1_ref[...], xt_ref[...], preferred_element_type=jnp.float32)
    h = jnp.maximum(h + b1_ref[...], 0.0)
    q_t = jnp.dot(w2_ref[...], h, preferred_element_type=jnp.float32) + b2_ref[...]
    qt_ref[...] = q_t

    # argmax over actions (sublane axis 0), first-occurrence tie-break.
    n_out = q_t.shape[0]
    row_ids = jax.lax.broadcasted_iota(jnp.int32, q_t.shape, 0).astype(jnp.float32)
    max_q = jnp.max(q_t, axis=0, keepdims=True)                      # [1, B]
    cand = jnp.where(q_t >= max_q, row_ids, jnp.float32(n_out))
    act_ref[...] = jnp.min(cand, axis=0, keepdims=True).astype(jnp.int32)


# -----------------------------------------------------------------------------
# Wrappers
# -----------------------------------------------------------------------------
def qnetwork_forward(x, w1, b1, w2, b2, *, tb=128):
    """Batched forward. x: [B, n_in] f32 -> q: [B, n_out] f32.

    Weights in PyTorch layout: w1 [H, n_in], b1 [H], w2 [n_out, H], b2 [n_out].
    """
    B, n_in = x.shape
    H = w1.shape[0]
    n_out = w2.shape[0]

    # Lane-dense transposed activation slab; pad batch up to a tile multiple.
    x_t = x.T                                  # [n_in, B]
    bp = tb * pl.cdiv(B, tb)
    if bp != B:
        x_t = jnp.pad(x_t, ((0, 0), (0, bp - B)))

    q_t = pl.pallas_call(
        _qnet_fwd_kernel,
        out_shape=jax.ShapeDtypeStruct((n_out, bp), jnp.float32),
        grid=(bp // tb,),
        in_specs=[
            pl.BlockSpec((n_in, tb), lambda i: (0, i)),   # x tile tracks the grid
            pl.BlockSpec((H, n_in), lambda i: (0, 0)),    # weights stay VMEM-resident
            pl.BlockSpec((H, 1), lambda i: (0, 0)),
            pl.BlockSpec((n_out, H), lambda i: (0, 0)),
            pl.BlockSpec((n_out, 1), lambda i: (0, 0)),
        ],
        out_specs=pl.BlockSpec((n_out, tb), lambda i: (0, i)),
        compiler_params=pltpu.CompilerParams(
            # Batch tiles are independent: "parallel" lets v7x's 2 TensorCores
            # split the grid; harmless on single-TC v5e/v6e.
            dimension_semantics=("parallel",)),
    )(x_t, w1, b1.reshape(H, 1), w2, b2.reshape(n_out, 1))

    return q_t[:, :B].T


def qnetwork_act(obs, w1, b1, w2, b2):
    """act() path. obs: [B, n_in] (or [n_in]) -> (q [B, n_out], action int32 [B])."""
    if obs.ndim == 1:
        obs = obs[None, :]
    B, n_in = obs.shape
    H = w1.shape[0]
    n_out = w2.shape[0]

    q_t, act = pl.pallas_call(
        _qnet_act_kernel,
        out_shape=(
            jax.ShapeDtypeStruct((n_out, B), jnp.float32),
            jax.ShapeDtypeStruct((1, B), jnp.int32),
        ),
        # No grid, no pipeline scaffolding: everything is one tiny VMEM block.
        in_specs=[pl.BlockSpec(memory_space=pltpu.MemorySpace.VMEM)] * 5,
        out_specs=(
            pl.BlockSpec(memory_space=pltpu.MemorySpace.VMEM),
            pl.BlockSpec(memory_space=pltpu.MemorySpace.VMEM),
        ),
    )(obs.T, w1, b1.reshape(H, 1), w2, b2.reshape(n_out, 1))

    return q_t.T, act[0]


def init_qnetwork_params(key, n_input, n_output, hidden=128):
    """PyTorch nn.Linear-style init, weights kept in PyTorch [out, in] layout."""
    k1, k2, k3, k4 = jax.random.split(key, 4)
    bound1 = 1.0 / jnp.sqrt(jnp.float32(n_input))
    bound2 = 1.0 / jnp.sqrt(jnp.float32(hidden))
    w1 = jax.random.uniform(k1, (hidden, n_input), jnp.float32, -bound1, bound1)
    b1 = jax.random.uniform(k2, (hidden,), jnp.float32, -bound1, bound1)
    w2 = jax.random.uniform(k3, (n_output, hidden), jnp.float32, -bound2, bound2)
    b2 = jax.random.uniform(k4, (n_output,), jnp.float32, -bound2, bound2)
    return w1, b1, w2, b2


if __name__ == "__main__":
    # CartPole-v1: observation dim 4, action dim 2, hidden 128.
    n_input, n_output, hidden = 4, 2, 128

    key = jax.random.PRNGKey(0)
    kx, kobs, kp = jax.random.split(key, 3)
    w1, b1, w2, b2 = init_qnetwork_params(kp, n_input, n_output, hidden)

    # --- Batched forward (replay-buffer style): real grid, 2 tiles of 128 ----
    batch = 256
    x = jax.random.normal(kx, (batch, n_input), jnp.float32)
    q = qnetwork_forward(x, w1, b1, w2, b2, tb=128)
    q = jax.block_until_ready(q)

    q_ref = jnp.maximum(x @ w1.T + b1, 0.0) @ w2.T + b2
    assert q.shape == (batch, n_output)
    assert jnp.allclose(q, q_ref, atol=1e-5, rtol=1e-5)

    # --- act() path: tiny batch, q-values + argmax fused into one kernel -----
    obs = jax.random.normal(kobs, (2, n_input), jnp.float32)
    q_small, action = qnetwork_act(obs, w1, b1, w2, b2)
    q_small = jax.block_until_ready(q_small)
    action = jax.block_until_ready(action)

    q_small_ref = jnp.maximum(obs @ w1.T + b1, 0.0) @ w2.T + b2
    assert q_small.shape == (2, n_output) and action.shape == (2,)
    assert jnp.allclose(q_small, q_small_ref, atol=1e-5, rtol=1e-5)
    # Fused in-kernel argmax must match argmax of the (verified) q-values.
    assert jnp.array_equal(action, jnp.argmax(q_small, axis=-1).astype(jnp.int32))

    print("KERNEL_OK")
</pallas_src>

<mosaic_0001>
module attributes {stable_mosaic.version = 11 : i64} {
  func.func @_qnet_fwd_kernel(%arg0: i32, %arg1: memref<4x128xf32, #tpu.memory_space<vmem>>, %arg2: memref<128x4xf32, #tpu.memory_space<vmem>>, %arg3: memref<128x1xf32, #tpu.memory_space<vmem>>, %arg4: memref<2x128xf32, #tpu.memory_space<vmem>>, %arg5: memref<2x1xf32, #tpu.memory_space<vmem>>, %arg6: memref<2x128xf32, #tpu.memory_space<vmem>>) attributes {dimension_semantics = [#tpu.dimension_semantics<parallel>], iteration_bounds = array<i64: 2>, scalar_prefetch = 0 : i64, scratch_operands = 0 : i64, tpu.core_type = #tpu.core_type<tc>, window_params = [{transform_indices = @transform_0, window_bounds = array<i64: 4, 128>}, {pipeline_mode = #tpu.pipeline_mode<synchronous>, transform_indices = @transform_1, window_bounds = array<i64: 128, 4>}, {pipeline_mode = #tpu.pipeline_mode<synchronous>, transform_indices = @transform_2, window_bounds = array<i64: 128, 1>}, {pipeline_mode = #tpu.pipeline_mode<synchronous>, transform_indices = @transform_3, window_bounds = array<i64: 2, 128>}, {pipeline_mode = #tpu.pipeline_mode<synchronous>, transform_indices = @transform_4, window_bounds = array<i64: 2, 1>}, {transform_indices = @transform_5, window_bounds = array<i64: 2, 128>}]} {
    %c0 = arith.constant 0 : index
    %c0_0 = arith.constant 0 : index
    %0 = vector.load %arg2[%c0, %c0_0] : memref<128x4xf32, #tpu.memory_space<vmem>>, vector<128x4xf32>
    %c0_1 = arith.constant 0 : index
    %c0_2 = arith.constant 0 : index
    %1 = vector.load %arg1[%c0_1, %c0_2] : memref<4x128xf32, #tpu.memory_space<vmem>>, vector<4x128xf32>
    %cst = arith.constant dense<0.000000e+00> : vector<128x128xf32>
    %2 = tpu.matmul %0, %1, %cst {dimension_numbers = #tpu.dot_dimension_numbers<[1], [0], [0], [1], [0, 0, 1, 1], [], []>} : vector<128x4xf32>, vector<4x128xf32>, vector<128x128xf32> -> vector<128x128xf32>
    %c0_3 = arith.constant 0 : index
    %c0_4 = arith.constant 0 : index
    %3 = vector.load %arg3[%c0_3, %c0_4] : memref<128x1xf32, #tpu.memory_space<vmem>>, vector<128x1xf32>
    %4 = vector.broadcast %3 : vector<128x1xf32> to vector<128x128xf32>
    %5 = arith.addf %2, %4 : vector<128x128xf32>
    %cst_5 = arith.constant 0.000000e+00 : f32
    %6 = vector.broadcast %cst_5 : f32 to vector<128x128xf32>
    %7 = arith.maximumf %5, %6 : vector<128x128xf32>
    %c0_6 = arith.constant 0 : index
    %c0_7 = arith.constant 0 : index
    %8 = vector.load %arg4[%c0_6, %c0_7] : memref<2x128xf32, #tpu.memory_space<vmem>>, vector<2x128xf32>
    %cst_8 = arith.constant dense<0.000000e+00> : vector<2x128xf32>
    %9 = tpu.matmul %8, %7, %cst_8 {dimension_numbers = #tpu.dot_dimension_numbers<[1], [0], [0], [1], [0, 0, 1, 1], [], []>} : vector<2x128xf32>, vector<128x128xf32>, vector<2x128xf32> -> vector<2x128xf32>
    %c0_9 = arith.constant 0 : index
    %c0_10 = arith.constant 0 : index
    %10 = vector.load %arg5[%c0_9, %c0_10] : memref<2x1xf32, #tpu.memory_space<vmem>>, vector<2x1xf32>
    %11 = vector.broadcast %10 : vector<2x1xf32> to vector<2x128xf32>
    %12 = arith.addf %9, %11 : vector<2x128xf32>
    %c0_11 = arith.constant 0 : index
    %c0_12 = arith.constant 0 : index
    %13 = vector.load %arg6[%c0_11, %c0_12] : memref<2x128xf32, #tpu.memory_space<vmem>>, vector<2x128xf32>
    tpu.vector_store %arg6[%c0_11, %c0_12], %12 {strides = array<i32>} : memref<2x128xf32, #tpu.memory_space<vmem>>, vector<2x128xf32>,
    return
  }
  func.func @transform_0(%arg0: i32) -> (i32, i32) {
    %c0_i32 = arith.constant 0 : i32
    %c0_i32_0 = arith.constant 0 : i32
    return %c0_i32, %arg0 : i32, i32
  }
  func.func @transform_1(%arg0: i32) -> (i32, i32) {
    %c0_i32 = arith.constant 0 : i32
    %c0_i32_0 = arith.constant 0 : i32
    %c0_i32_1 = arith.constant 0 : i32
    return %c0_i32, %c0_i32_0 : i32, i32
  }
  func.func @transform_2(%arg0: i32) -> (i32, i32) {
    %c0_i32 = arith.constant 0 : i32
    %c0_i32_0 = arith.constant 0 : i32
    %c0_i32_1 = arith.constant 0 : i32
    return %c0_i32, %c0_i32_0 : i32, i32
  }
  func.func @transform_3(%arg0: i32) -> (i32, i32) {
    %c0_i32 = arith.constant 0 : i32
    %c0_i32_0 = arith.constant 0 : i32
    %c0_i32_1 = arith.constant 0 : i32
    return %c0_i32, %c0_i32_0 : i32, i32
  }
  func.func @transform_4(%arg0: i32) -> (i32, i32) {
    %c0_i32 = arith.constant 0 : i32
    %c0_i32_0 = arith.constant 0 : i32
    %c0_i32_1 = arith.constant 0 : i32
    return %c0_i32, %c0_i32_0 : i32, i32
  }
  func.func @transform_5(%arg0: i32) -> (i32, i32) {
    %c0_i32 = arith.constant 0 : i32
    %c0_i32_0 = arith.constant 0 : i32
    return %c0_i32, %arg0 : i32, i32
  }
}

</mosaic_0001>

<bundles_post_ra>
// kernel: tpu_custom_call.1
= control target key start
LH: loop header
LB: loop body
LE: loop exit
PB: predicated region body
PF: predicated region fallthrough
CT: control target
= control target key end

     0   :  { %10 = vsyncpa [#allocation3], 0  ;;  %s1214_s0 = inlined_call_operand.vmem [shape: f32[4,256], index: 0, kind: input, shape index: {}]   ;;  %s1215_s1 = inlined_call_operand.vmem [shape: f32[128,4], index: 1, kind: input, shape index: {}]   ;;  %s1216_s2 = inlined_call_operand.vmem [shape: f32[128,1], index: 2, kind: input, shape index: {}]   ;;  %s1217_s3 = inlined_call_operand.vmem [shape: f32[2,128], index: 3, kind: input, shape index: {}]   ;;  %s1218_s4 = inlined_call_operand.vmem [shape: f32[2,1], index: 4, kind: input, shape index: {}]   ;;  %s1219_s5 = inlined_call_operand.hbm [shape: f32[2,256], index: 5, kind: output, shape index: {}]  }
   0x1   :  { %12 = vsyncpa [#allocation3 + $0x1], 0  ;;  %s988_s18 = smov 0   ;;  %s990_s19 = smov 0  }
   0x2   :  { %s992_s20 = smov 0   ;;  %s994_s21 = smov 0  }
   0x3 LB: > { %s1009_s22 = sadd.s32 4294967295, %s951_s21   ;;  %s698_s23 = sadd.s32 4294967294, %s951_s21   ;;  %s951_s21 = sphi %s994_s21, %s1225_s21   ;;  %s947_s20 = sphi %s992_s20, %s1224_s20   ;;  %s943_s19 = sphi %s990_s19, %s1223_s19   ;;  %s939_s18 = sphi %s988_s18, %s1222_s18  }
   0x4   : > { %s1013_s24 = sadd.s32 1, %s951_s21   ;;  %s135_s25 = sadd.s32 1, %s947_s20 }
   0x5   : > { %s132_s26 = ssub.s32 %s951_s21, %s1013_s24  ;;  %p145_p0 = scmp.ne.s32.totalorder %s947_s20, %s943_s19 }
   0x6   : > { %p133_p1 = scmp.eq.s32.totalorder %s132_s26, 0  ;;  %p146_p2 = scmp.eq.s32.totalorder %s1009_s22, 1 }
   0x7   : > { %p151_p3 = scmp.ne.s32.totalorder %s943_s19, %s939_s18  ;;  %p152_p4 = scmp.eq.s32.totalorder %s698_s23, 1 }
   0x8   : > { %s1024_s27 = scalar_select %p133_p1, %s947_s20, %s135_s25  }
   0x9   : > { %p1026_p5 = por %p146_p2, %p145_p0  ;;  %p1030_p6 = por %p152_p4, %p151_p3 }
   0xa   : > { %p701_p7 = scmp.ge.s32.totalorder %s951_s21, 1  ;;  %p189_p8 = scmp.lt.s32.totalorder %s951_s21, 3 }
   0xc   : > { %p190_p9 = pnand %p701_p7, %p189_p8 }
   0xd   : > { %p216_p10 = scmp.lt.s32.totalorder (!%p190_p9), %s1009_s22, 1  ;;  %v220_v0 = vld [vmem:[%s1215_s1] sm:$0xff] (!%p190_p9)  ;;  %vm333_vm0 = vcmask (!%p190_p9), 31744   ;;  %v953_v1 = vmov (!%p190_p9), 0   ;;  %vm382_vm1 = vcmask (!%p190_p9), 1043456   ;;  %v221_v4 = vld [vmem:[%s1215_s1 + $0x8] sm:$0xff] (!%p190_p9) }
   0xe   : > { %193 = sbr.rel (%p190_p9) target bundleno = 506 (0x1fa), region = 40  ;;  %761 = vmatprep.mubr.msk.f32.mxu0 (!%p190_p9), %vm333_vm0, %v220_v0  ;;  %887 = vset.pattern.permute.xlu0 (!%p190_p9), %v953_v1  ;;  %v237_v2 = vld [vmem:[%s1216_s2] sm:$0xff] (!%p190_p9)  ;;  %v239_v5 = vld [vmem:[%s1216_s2 + $0x10] sm:$0xff] (!%p190_p9)  ;;  %v238_v7 = vld [vmem:[%s1216_s2 + $0x8] sm:$0xff] (!%p190_p9)  ;;  %v954_v35 = vmov (!%p190_p9), 0.0|0.0   ;;  %vm955_vm2 = vmmov (!%p190_p9), 0  }
   0xf   : > { %888 = vset.pattern.permute.xlu1 (!%p190_p9), %v953_v1  ;;  %255 = vperm.xlu0 (!%p190_p9), %887, %v237_v2   ;;  %v222_v6 = vld [vmem:[%s1215_s1 + $0x10] sm:$0xff] (!%p190_p9)  ;;  %v240_v8 = vld [vmem:[%s1216_s2 + $0x18] sm:$0xff] (!%p190_p9)  ;;  %v224_v10 = vld [vmem:[%s1215_s1 + $0x20] sm:$0xff] (!%p190_p9)  ;;  %v956_v36 = vmov (!%p190_p9), 0.0   ;;  %s213_s14 = sand.u32 (!%p190_p9), 1, %s943_s19   ;;  %s722_s16 = sshll.u32 (!%p190_p9), %s1009_s22, 5 }
  0x10   : > { %265 = vperm.xlu1 (!%p190_p9), %888, %v239_v5   ;;  %v223_v9 = vld [vmem:[%s1215_s1 + $0x18] sm:$0xff] (!%p190_p9)  ;;  %v241_v11 = vld [vmem:[%s1216_s2 + $0x20] sm:$0xff] (!%p190_p9)  ;;  %v242_v12 = vld [vmem:[%s1216_s2 + $0x28] sm:$0xff] (!%p190_p9)  ;;  %820 = vmatprep.subr.bf16.mxu1 (!%p190_p9), %v954_v35  ;;  %s702_s15 = sshll.u32 (!%p190_p9), %s213_s14, 1  ;;  %s1172_s30 = scalar_lea.hbm (!%p190_p9), %s1219_s5, %s722_s16 }
  0x11   : > { %v225_v13 = vld [vmem:[%s1215_s1 + $0x28] sm:$0xff] (!%p190_p9)  ;;  %v226_v14 = vld [vmem:[%s1215_s1 + $0x30] sm:$0xff] (!%p190_p9)  ;;  %v244_v16 = vld [vmem:[%s1216_s2 + $0x38] sm:$0xff] (!%p190_p9)  ;;  %817 = vmatprep.mubr.msk.f32.mxu1 (!%p190_p9), %vm955_vm2, %v956_v36  ;;  %s215_s17 = scalar_lea.vmem (!%p190_p9), [#allocation2], %s702_s15  ;;  %s626_s6 = scalar_lea.sflag (!%p190_p9), [#allocation3], %s213_s14 }
  0x12   : > { %v243_v15 = vld [vmem:[%s1216_s2 + $0x30] sm:$0xff] (!%p190_p9)  ;;  %v227_v17 = vld [vmem:[%s1215_s1 + $0x38] sm:$0xff] (!%p190_p9)  ;;  %v228_v18 = vld [vmem:[%s1215_s1 + $0x40] sm:$0xff] (!%p190_p9)  ;;  %s639_s23 = sshll.u32 (!%p190_p9), %s215_s17, 4  ;;  %s1174_s23 = int_to_ptr.vmem [resolvable:$true] %s639_s23 }
  0x13   : > { %260 = vperm.xlu0 (!%p190_p9), %887, %v238_v7   ;;  %v245_v19 = vld [vmem:[%s1216_s2 + $0x40] sm:$0xff] (!%p190_p9)  ;;  %v246_v20 = vld [vmem:[%s1216_s2 + $0x48] sm:$0xff] (!%p190_p9)  ;;  %v230_v22 = vld [vmem:[%s1215_s1 + $0x50] sm:$0xff] (!%p190_p9) }
  0x14   : > { %270 = vperm.xlu1 (!%p190_p9), %888, %v240_v8   ;;  %v229_v21 = vld [vmem:[%s1215_s1 + $0x48] sm:$0xff] (!%p190_p9)  ;;  %v247_v23 = vld [vmem:[%s1216_s2 + $0x50] sm:$0xff] (!%p190_p9)  ;;  %v248_v24 = vld [vmem:[%s1216_s2 + $0x58] sm:$0xff] (!%p190_p9) }
  0x15   : > { %s217_s7 = scalar_select %p216_p10, %s1009_s22, 1  ;;  %v231_v25 = vld [vmem:[%s1215_s1 + $0x58] sm:$0xff]  ;;  %v232_v26 = vld [vmem:[%s1215_s1 + $0x60] sm:$0xff]  ;;  %v250_v28 = vld [vmem:[%s1216_s2 + $0x68] sm:$0xff] }
  0x16   : > { %v249_v27 = vld [vmem:[%s1216_s2 + $0x60] sm:$0xff]  ;;  %v233_v29 = vld [vmem:[%s1215_s1 + $0x68] sm:$0xff]  ;;  %v234_v30 = vld [vmem:[%s1215_s1 + $0x70] sm:$0xff]  ;;  %s957_s22 = smov [#allocation2]  }
  0x17   : > { %s703_s8 = sshll.u32 %s217_s7, 2  ;;  %275 = vperm.xlu0 %887, %v241_v11   ;;  %v251_v31 = vld [vmem:[%s1216_s2 + $0x70] sm:$0xff]  ;;  %v252_v32 = vld [vmem:[%s1216_s2 + $0x78] sm:$0xff]  ;;  %v548_v34 = vld [vmem:[%s1218_s4] sm:$0x3]  ;;  %s889_s7 = scalar_lea.vmem %s1174_s23, 32 }
  0x18   : > { %s219_s11 = scalar_lea.vmem %s1214_s0, %s703_s8  ;;  %280 = vperm.xlu1 %888, %v242_v12   ;;  %v235_v33 = vld [vmem:[%s1215_s1 + $0x78] sm:$0xff]  ;;  %p890_p11 = scmp.ne.s32.totalorder %s1174_s23, %s889_s7 }
  0x19   : > { %v236_v3 = vld [vmem:[%s219_s11] sm:$0xf]  ;;  %s893_s8 = sshll.u32 %s957_s22, 4  ;;  %s894_s8 = int_to_ptr.vmem [resolvable:$false] %s893_s8 }
  0x1a   : > { %759 = vmatprep.subr.msk.mxu0 %vm382_vm1, %v236_v3  ;;  %p891_p12 = pnand %p890_p11, %p1026_p5  ;;  %s895_s9 = scalar_lea.vmem %s894_s8, 64 }
  0x1b   : > { %760 = vmatpush3.msk.msra.mxu0 %vm382_vm1, %v236_v3  ;;  %285 = vperm.xlu0 %887, %v243_v15   ;;  %p896_p0 = scmp.lt.s32.totalorder %s1174_s23, %s894_s8  ;;  %p897_p1 = scmp.lt.s32.totalorder %s895_s9, %s889_s7 }
  0x1c   : > { %762 = vmatmul.mubr.msk.f32.vlgmr.msra.gmra.mrb[0].mxu0 %vm333_vm0, %v221_v4  ;;  %290 = vperm.xlu1 %888, %v244_v16   ;;  %p892_p13 = pneg %p891_p12 }
  0x1d   : > { %764 = vmatprep.mubr.msk.f32.mxu0 %vm333_vm0, %v222_v6  ;;  %p898_p2 = por %p897_p1, %p896_p0 }
  0x1f   : > { %295 = vperm.xlu0 %887, %v245_v19   ;;  %p899_p3 = pnand %p898_p2, %p892_p13 }
  0x20   : > { %765 = vmatmul.mubr.msk.f32.gmra.mrb[2].mxu0 %vm333_vm0, %v223_v9  ;;  %300 = vperm.xlu1 %888, %v246_v20  }
  0x21   : > { %767 = vmatprep.mubr.msk.f32.mxu0 %vm333_vm0, %v224_v10 }
  0x23   : > { %305 = vperm.xlu0 %887, %v247_v23  }
  0x24   : > { %768 = vmatmul.mubr.msk.f32.gmra.mrb[4].mxu0 %vm333_vm0, %v225_v13  ;;  %310 = vperm.xlu1 %888, %v248_v24  }
  0x25   : > { %770 = vmatprep.mubr.msk.f32.mxu0 %vm333_vm0, %v226_v14 }
  0x27   : > { %315 = vperm.xlu0 %887, %v249_v27  }
  0x28   : > { %771 = vmatmul.mubr.msk.f32.gmra.mrb[6].mxu0 %vm333_vm0, %v227_v17  ;;  %320 = vperm.xlu1 %888, %v250_v28  }
  0x29   : > { %773 = vmatprep.mubr.msk.f32.mxu0 %vm333_vm0, %v228_v18 }
  0x2b   : > { %325 = vperm.xlu0 %887, %v251_v31  }
  0x2c   : > { %774 = vmatmul.mubr.msk.f32.gmra.mrb[8].mxu0 %vm333_vm0, %v229_v21  ;;  %330 = vperm.xlu1 %888, %v252_v32  }
  0x2d   : > { %776 = vmatprep.mubr.msk.f32.mxu0 %vm333_vm0, %v230_v22 }
  0x2f   : > { %551 = vperm.xlu0 %887, %v548_v34  }
  0x30   : > { %777 = vmatmul.mubr.msk.f32.gmra.mrb[10].mxu0 %vm333_vm0, %v231_v25 }
  0x31   : > { %779 = vmatprep.mubr.msk.f32.mxu0 %vm333_vm0, %v232_v26 }
  0x34   : > { %780 = vmatmul.mubr.msk.f32.gmra.mrb[12].mxu0 %vm333_vm0, %v233_v29 }
  0x35   : > { %782 = vmatprep.mubr.msk.f32.mxu0 %vm333_vm0, %v234_v30 }
  0x38   : > { %783 = vmatmul.mubr.msk.f32.gmra.mrb[14].mxu0 %vm333_vm0, %v235_v33 }
  0x8e   : > { %v256_v38 = vpop.permute.xlu0 %255 }
  0x8f   : > { %v266_v37 = vpop.permute.xlu1 %265 }
  0x92   : > { %v261_v40 = vpop.permute.xlu0 %260 }
  0x93   : > { %v271_v39 = vpop.permute.xlu1 %270 }
  0x96   : > { %v276_v42 = vpop.permute.xlu0 %275 }
  0x97   : > { %v281_v41 = vpop.permute.xlu1 %280 }
  0x9a   : > { %v286_v51 = vpop.permute.xlu0 %285 }
  0x9b   : > { %v291_v48 = vpop.permute.xlu1 %290 }
  0x9e   : > { %v296_v0 = vpop.permute.xlu0 %295 }
  0x9f   : > { %v301_v61 = vpop.permute.xlu1 %300 }
  0xa2   : > { %v306_v12 = vpop.permute.xlu0 %305 }
  0xa3   : > { %v311_v9 = vpop.permute.xlu1 %310 }
  0xa6   : > { %v316_v25 = vpop.permute.xlu0 %315 }
  0xa7   : > { %v321_v22 = vpop.permute.xlu1 %320 }
  0xab   : > { %v331_v34 = vpop.permute.xlu1 %330 }
  0xef   : > { %v763_v43 = vpop.f32.mrb[0].mxu0 }
  0xf0   : > { %v458_v44 = vadd.f32 %v763_v43, %v261_v40  ;;  %v452_v45 = vpop.f32.mrb[1].mxu0 }
  0xf1   : > { %v453_v46 = vadd.f32 %v452_v45, %v256_v38  ;;  %v326_v38 = vpop.permute.xlu0 %325 }
  0xf2   : > { %v532_v47 = vmax.f32 %v458_v44, 0.0 }
  0xf3   : > { %v531_v49 = vmax.f32 %v453_v46, 0.0  ;;  %v766_v50 = vpop.f32.mrb[2].mxu0  ;;  %v547_v46 = vld [vmem:[%s1217_s3] sm:$0x3] }
  0xf4   : > { %v468_v52 = vadd.f32 %v766_v50, %v271_v39  ;;  %v462_v53 = vpop.f32.mrb[3].mxu0 }
  0xf5   : > { %v463_v54 = vadd.f32 %v462_v53, %v266_v37  ;;  %v821_v55 = vpack.c.bf16 %v532_v47, %v531_v49  ;;  %v552_v47 = vpop.permute.xlu0 %551 }
  0xf6   : > { %v534_v56 = vmax.f32 %v468_v52, 0.0 }
  0xf7   : > { %v533_v57 = vmax.f32 %v463_v54, 0.0  ;;  %v769_v58 = vpop.f32.mrb[4].mxu0  ;;  %822 = vmatpush3.bf16.msra.mxu1 %v821_v55 }
  0xf8   : > { %v478_v59 = vadd.f32 %v769_v58, %v281_v41  ;;  %v472_v60 = vpop.f32.mrb[5].mxu0  ;;  %823 = vmatprep.subr.bf16.mxu1 %v954_v35 }
  0xf9   : > { %v824_v62 = vpack.c.bf16 %v534_v56, %v533_v57  ;;  %v473_v63 = vadd.f32 %v472_v60, %v276_v42 }
  0xfa   : > { %v536_v1 = vmax.f32 %v478_v59, 0.0 }
  0xfb   : > { %v535_v2 = vmax.f32 %v473_v63, 0.0  ;;  %v772_v3 = vpop.f32.mrb[6].mxu0  ;;  %825 = vmatpush3.bf16.msra.mxu1 %v824_v62 }
  0xfc   : > { %v488_v4 = vadd.f32 %v772_v3, %v291_v48  ;;  %v482_v5 = vpop.f32.mrb[7].mxu0  ;;  %826 = vmatprep.subr.bf16.mxu1 %v954_v35 }
  0xfd   : > { %v827_v6 = vpack.c.bf16 %v536_v1, %v535_v2  ;;  %v483_v7 = vadd.f32 %v482_v5, %v286_v51 }
  0xfe   : > { %v538_v8 = vmax.f32 %v488_v4, 0.0 }
  0xff   : > { %v537_v10 = vmax.f32 %v483_v7, 0.0  ;;  %v775_v11 = vpop.f32.mrb[8].mxu0  ;;  %828 = vmatpush3.bf16.msra.mxu1 %v827_v6 }
 0x100   : > { %v498_v13 = vadd.f32 %v775_v11, %v301_v61  ;;  %v492_v14 = vpop.f32.mrb[9].mxu0  ;;  %829 = vmatprep.subr.bf16.mxu1 %v954_v35 }
 0x101   : > { %v830_v15 = vpack.c.bf16 %v538_v8, %v537_v10  ;;  %v493_v16 = vadd.f32 %v492_v14, %v296_v0 }
 0x102   : > { %v540_v17 = vmax.f32 %v498_v13, 0.0 }
 0x103   : > { %v539_v18 = vmax.f32 %v493_v16, 0.0  ;;  %v778_v19 = vpop.f32.mrb[10].mxu0  ;;  %831 = vmatpush3.bf16.msra.mxu1 %v830_v15 }
 0x104   : > { %v508_v20 = vadd.f32 %v778_v19, %v311_v9  ;;  %v502_v21 = vpop.f32.mrb[11].mxu0  ;;  %832 = vmatprep.subr.bf16.mxu1 %v954_v35 }
 0x105   : > { %v833_v23 = vpack.c.bf16 %v540_v17, %v539_v18  ;;  %v503_v24 = vadd.f32 %v502_v21, %v306_v12 }
 0x106   : > { %v542_v26 = vmax.f32 %v508_v20, 0.0 }
 0x107   : > { %v541_v27 = vmax.f32 %v503_v24, 0.0  ;;  %v781_v28 = vpop.f32.mrb[12].mxu0  ;;  %834 = vmatpush3.bf16.msra.mxu1 %v833_v23 }
 0x108   : > { %v518_v29 = vadd.f32 %v781_v28, %v321_v22  ;;  %v512_v30 = vpop.f32.mrb[13].mxu0  ;;  %835 = vmatprep.subr.bf16.mxu1 %v954_v35 }
 0x109   : > { %v836_v31 = vpack.c.bf16 %v542_v26, %v541_v27  ;;  %v513_v32 = vadd.f32 %v512_v30, %v316_v25 }
 0x10a   : > { %v544_v33 = vmax.f32 %v518_v29, 0.0 }
 0x10b   : > { %v543_v36 = vmax.f32 %v513_v32, 0.0  ;;  %v784_v37 = vpop.f32.mrb[14].mxu0  ;;  %837 = vmatpush3.bf16.msra.mxu1 %v836_v31 }
 0x10c   : > { %v528_v39 = vadd.f32 %v784_v37, %v331_v34  ;;  %v522_v40 = vpop.f32.mrb[15].mxu0  ;;  %838 = vmatprep.subr.bf16.mxu1 %v954_v35 }
 0x10d   : > { %v839_v41 = vpack.c.bf16 %v544_v33, %v543_v36  ;;  %v523_v42 = vadd.f32 %v522_v40, %v326_v38 }
 0x10e   : > { %v546_v43 = vmax.f32 %v528_v39, 0.0 }
 0x10f   : > { %v545_v44 = vmax.f32 %v523_v42, 0.0  ;;  %840 = vmatpush3.bf16.msra.mxu1 %v839_v41 }
 0x110   : > { %841 = vmatprep.subr.bf16.mxu1 %v954_v35 }
 0x111   : > { %v842_v45 = vpack.c.bf16 %v546_v43, %v545_v44 }
 0x113   : > { %843 = vmatpush3.bf16.msra.mxu1 %v842_v45 }
 0x116   : > { %818 = vmatmul.mubr.f32.vlgmr.msra.gmra.mrb[0].mxu1 %v547_v46 }
 0x1e9   : > { %v620_v48 = vpop.f32.mrb[0].mxu1 }
 0x1ea   : > { %v621_v49 = vadd.f32 %v620_v48, %v552_v47  ;;  %v819_v50 = vpop.f32.mrb[1].mxu1 }
 0x1ec   : > { %624 = vst [vmem:[%s215_s17] sm:$0x3] %v621_v49 }
 0x1ed   : > { %902 = shalt.err (!%p899_p3)
}
 0x1ee   : > { %s903_s10 = scalar_lea.hbm %s1172_s30, 32  ;;  %s907_s13 = scalar_lea.hbm %s1219_s5, 64 }
 0x1ef   : > { %p904_p4 = scmp.ne.s32.totalorder %s1172_s30, %s903_s10  ;;  %p908_p9 = scmp.lt.u32.totalorder %s1172_s30, %s1219_s5 }
 0x1f0   : > { %p909_p10 = scmp.lt.u32.totalorder %s907_s13, %s903_s10  ;;  %p911_p12 = scmp.lt.u32.totalorder %s903_s10, %s1172_s30 }
 0x1f1   : > { %p905_p7 = pnand %p904_p4, %p1026_p5 }
 0x1f2   : > { %p910_p11 = por %p909_p10, %p908_p9 }
 0x1f3   : > { %p906_p8 = pneg %p905_p7 }
 0x1f4   : > { %p912_p13 = por %p911_p12, %p910_p11 }
 0x1f6   : > { %p913_p0 = pnand %p912_p13, %p906_p8 }
 0x1f8   : > { %916 = shalt.err (!%p913_p0)
}
 0x1f9   : > { %844 = dma.vmem_to_hbm [thread:$0]  (%p1026_p5), %s1174_s23, 32, %s1172_s30, %s626_s6  }
 0x1fa PF: > { %p850_p1 = scmp.ge.s32.totalorder %s951_s21, 2  ;;  %s651_s16 = sand.u32 1, %s939_s18  }
 0x1fb   : > { %s652_s17 = scalar_lea.sflag [#allocation3], %s651_s16 }
 0x1fc   : > { %p847_p2 = pnand %p850_p1, %p1030_p6 }
 0x1fe   : > { %934 = dma.done.wait (!%p847_p2), %s652_s17, 32  }
 0x1ff   : > { %936 = vsyncadd (!%p847_p2), %s652_s17, 4294967264  ;;  %p15_p3 = scmp.ge.s32.totalorder %s1013_s24, 4   ;;  %s1222_s18 = smov %s943_s19 }
 0x200   : > { %s1223_s19 = smov %s947_s20  ;;  %s1224_s20 = smov %s1024_s27 }
 0x201   : > { %s1225_s21 = smov %s1013_s24  ;;  %17 = sbr.rel (!%p15_p3) target bundleno = 3 (0x3), region = 75 }
 0x208   :  { %657 = vsyncpa [#allocation3], 1 }
 0x209   :  { %659 = vsyncpa [#allocation3 + $0x1], 1 }

</bundles_post_ra>
